<compile_context>
chip_gen: v7x
topology: tpu7x:2x2x1
jax: 0.10.0
libtpu: 0.0.40
codegen_flags: <defaults>
</compile_context>

<pallas_src>
import numpy as np
import jax
import jax.numpy as jnp
from jax.experimental import pallas as pl
from jax.experimental.pallas import tpu as pltpu


def _lstm_recurrence_kernel(
    h0_ref, c0_ref,            # (B, H) initial state from the init MLPs
    whh_t_ref, bg_ref,         # LSTM recurrent weights (H, 4H), combined bias (1, 4H)
    wout_t_ref, bout_ref,      # output linear (H, O), (1, O)
    out_ref,                   # (T*B, O) predictions, rows in (t-major, b-minor) order
    hs_scr,                    # VMEM scratch (T*B, H) for all hidden states
):
    B, H = h0_ref.shape
    T = hs_scr.shape[0] // B

    # Hoist loop-invariant loads / broadcasts out of the unrolled time loop.
    whh = whh_t_ref[...]                                   # (H, 4H)
    bg = jnp.broadcast_to(bg_ref[...], (B, 4 * H))         # (B, 4H), broadcast once

    h = h0_ref[...]
    c = c0_ref[...]

    # Fully-unrolled recurrence (seq_len is static and small); h/c are
    # loop-carried values, not re-read from scratch each step.
    for t in range(T):
        gates = jnp.dot(h, whh, preferred_element_type=jnp.float32) + bg   # (B, 4H)
        # Full-vreg transcendentals (4H = 128 lanes), then lane slices.
        sig = jax.nn.sigmoid(gates)
        tnh = jnp.tanh(gates)
        i_g = sig[:, 0:H]           # input gate
        f_g = sig[:, H:2 * H]       # forget gate
        g_g = tnh[:, 2 * H:3 * H]   # cell candidate
        o_g = sig[:, 3 * H:4 * H]   # output gate

        c = f_g * c + i_g * g_g
        h = o_g * jnp.tanh(c)

        hs_scr[t * B:(t + 1) * B, :] = h                   # static-offset store

    # Batched output projection: one matmul + one store for the whole sequence.
    hs = hs_scr[...]                                       # (T*B, H)
    preds = jnp.dot(hs, wout_t_ref[...], preferred_element_type=jnp.float32) + bout_ref[...]
    out_ref[...] = preds


def lstm_init_to_many(x, params, seq_len):
    """x: (B, input_size) float32 -> predictions (B, seq_len, output_size)."""
    B, _ = x.shape
    H = params["wh2"].shape[1]
    O = params["wout_t"].shape[1]

    # One-shot init MLPs hoisted out of the Pallas kernel (plain JAX / XLA).
    h0 = jnp.maximum(x @ params["wh1"] + params["bh1"], 0.0) @ params["wh2"] + params["bh2"]
    c0 = jnp.maximum(x @ params["wc1"] + params["bc1"], 0.0) @ params["wc2"] + params["bc2"]

    preds_flat = pl.pallas_call(
        _lstm_recurrence_kernel,
        out_shape=jax.ShapeDtypeStruct((seq_len * B, O), jnp.float32),
        scratch_shapes=[pltpu.VMEM((seq_len * B, H), jnp.float32)],
    )(h0, c0, params["whh_t"], params["bg"], params["wout_t"], params["bout"])

    # Rows are (t-major, b-minor): tiny metadata reshape + transpose back to
    # PyTorch's batch_first layout (B, T, O).
    return jnp.transpose(preds_flat.reshape(seq_len, B, O), (1, 0, 2))


def make_params(key, input_size=6, hidden=32, output_size=2, mlp_hidden=200):
    """Deterministic synthetic parameters (PyTorch-style uniform init scales)."""
    ks = jax.random.split(key, 16)

    def uni(k, shape, fan_in):
        bound = 1.0 / np.sqrt(fan_in)
        return jax.random.uniform(k, shape, jnp.float32, -bound, bound)

    p = {
        # linear_in_h: Linear(I, 200) -> ReLU -> Linear(200, H)  (weights stored transposed: x @ W)
        "wh1": uni(ks[0], (input_size, mlp_hidden), input_size),
        "bh1": uni(ks[1], (1, mlp_hidden), input_size),
        "wh2": uni(ks[2], (mlp_hidden, hidden), mlp_hidden),
        "bh2": uni(ks[3], (1, hidden), mlp_hidden),
        # linear_in_c
        "wc1": uni(ks[4], (input_size, mlp_hidden), input_size),
        "bc1": uni(ks[5], (1, mlp_hidden), input_size),
        "wc2": uni(ks[6], (mlp_hidden, hidden), mlp_hidden),
        "bc2": uni(ks[7], (1, hidden), mlp_hidden),
        # LSTM (input_size=1, but dummy input is all zeros so W_ih contributes nothing)
        "whh_t": uni(ks[8], (hidden, 4 * hidden), hidden),   # W_hh^T, gate order [i, f, g, o]
        "b_ih": uni(ks[9], (1, 4 * hidden), hidden),
        "b_hh": uni(ks[10], (1, 4 * hidden), hidden),
        # linear_out
        "wout_t": uni(ks[11], (hidden, output_size), hidden),
        "bout": uni(ks[12], (1, output_size), hidden),
    }
    p["bg"] = p["b_ih"] + p["b_hh"]  # combined bias used every step (zero LSTM input)
    return p


def reference_forward(x, p, seq_len):
    """Pure-JAX reference matching the PyTorch forward."""
    H = p["wh2"].shape[1]
    h = jnp.maximum(x @ p["wh1"] + p["bh1"], 0.0) @ p["wh2"] + p["bh2"]
    c = jnp.maximum(x @ p["wc1"] + p["bc1"], 0.0) @ p["wc2"] + p["bc2"]

    def step(carry, _):
        h, c = carry
        gates = h @ p["whh_t"] + p["bg"]
        i = jax.nn.sigmoid(gates[:, 0:H])
        f = jax.nn.sigmoid(gates[:, H:2 * H])
        g = jnp.tanh(gates[:, 2 * H:3 * H])
        o = jax.nn.sigmoid(gates[:, 3 * H:4 * H])
        c = f * c + i * g
        h = o * jnp.tanh(c)
        return (h, c), h

    (_, _), hs = jax.lax.scan(step, (h, c), None, length=seq_len)  # (T, B, H)
    preds = hs @ p["wout_t"] + p["bout"]                            # (T, B, O)
    return jnp.transpose(preds, (1, 0, 2))


if __name__ == "__main__":
    # Small shapes consistent with the module's forward.
    B, INPUT_SIZE, HIDDEN, OUTPUT_SIZE, SEQ_LEN = 4, 6, 32, 2, 8

    key = jax.random.PRNGKey(0)
    k_x, k_p = jax.random.split(key)
    x = jax.random.normal(k_x, (B, INPUT_SIZE), jnp.float32)
    params = make_params(k_p, input_size=INPUT_SIZE, hidden=HIDDEN, output_size=OUTPUT_SIZE)

    preds = lstm_init_to_many(x, params, SEQ_LEN)
    preds = jax.block_until_ready(preds)
    assert preds.shape == (B, SEQ_LEN, OUTPUT_SIZE), preds.shape

    ref = jax.block_until_ready(reference_forward(x, params, SEQ_LEN))
    np.testing.assert_allclose(np.asarray(preds), np.asarray(ref), rtol=1e-5, atol=1e-5)

    print("KERNEL_OK")
</pallas_src>

<mosaic_0001>
module attributes {stable_mosaic.version = 11 : i64} {
  func.func @_lstm_recurrence_kernel(%arg0: memref<4x32xf32, #tpu.memory_space<vmem>>, %arg1: memref<4x32xf32, #tpu.memory_space<vmem>>, %arg2: memref<32x128xf32, #tpu.memory_space<vmem>>, %arg3: memref<1x128xf32, #tpu.memory_space<vmem>>, %arg4: memref<32x2xf32, #tpu.memory_space<vmem>>, %arg5: memref<1x2xf32, #tpu.memory_space<vmem>>, %arg6: memref<32x2xf32, #tpu.memory_space<vmem>>, %arg7: memref<32x32xf32, #tpu.memory_space<vmem>>) attributes {dimension_semantics = [], scalar_prefetch = 0 : i64, scratch_operands = 1 : i64, tpu.core_type = #tpu.core_type<tc>} {
    %c0 = arith.constant 0 : index
    %c0_0 = arith.constant 0 : index
    %0 = vector.load %arg2[%c0, %c0_0] : memref<32x128xf32, #tpu.memory_space<vmem>>, vector<32x128xf32>
    %c0_1 = arith.constant 0 : index
    %c0_2 = arith.constant 0 : index
    %1 = vector.load %arg3[%c0_1, %c0_2] : memref<1x128xf32, #tpu.memory_space<vmem>>, vector<1x128xf32>
    %2 = vector.shape_cast %1 : vector<1x128xf32> to vector<1x128xf32>
    %3 = vector.broadcast %2 : vector<1x128xf32> to vector<4x128xf32>
    %c0_3 = arith.constant 0 : index
    %c0_4 = arith.constant 0 : index
    %4 = vector.load %arg0[%c0_3, %c0_4] : memref<4x32xf32, #tpu.memory_space<vmem>>, vector<4x32xf32>
    %c0_5 = arith.constant 0 : index
    %c0_6 = arith.constant 0 : index
    %5 = vector.load %arg1[%c0_5, %c0_6] : memref<4x32xf32, #tpu.memory_space<vmem>>, vector<4x32xf32>
    %cst = arith.constant dense<0.000000e+00> : vector<4x128xf32>
    %6 = tpu.matmul %4, %0, %cst {dimension_numbers = #tpu.dot_dimension_numbers<[1], [0], [0], [1], [0, 0, 1, 1], [], []>} : vector<4x32xf32>, vector<32x128xf32>, vector<4x128xf32> -> vector<4x128xf32>
    %7 = arith.addf %6, %3 : vector<4x128xf32>
    %8 = arith.negf %7 : vector<4x128xf32>
    %9 = math.exp %8 : vector<4x128xf32>
    %cst_7 = arith.constant 1.000000e+00 : f32
    %10 = vector.broadcast %cst_7 : f32 to vector<4x128xf32>
    %11 = arith.addf %10, %9 : vector<4x128xf32>
    %12 = arith.divf %10, %11 : vector<4x128xf32>
    %13 = math.tanh %7 : vector<4x128xf32>
    %14 = vector.extract_strided_slice %12 {offsets = [0, 0], sizes = [4, 32], strides = [1, 1]} : vector<4x128xf32> to vector<4x32xf32>
    %15 = vector.extract_strided_slice %12 {offsets = [0, 32], sizes = [4, 32], strides = [1, 1]} : vector<4x128xf32> to vector<4x32xf32>
    %16 = vector.extract_strided_slice %13 {offsets = [0, 64], sizes = [4, 32], strides = [1, 1]} : vector<4x128xf32> to vector<4x32xf32>
    %17 = vector.extract_strided_slice %12 {offsets = [0, 96], sizes = [4, 32], strides = [1, 1]} : vector<4x128xf32> to vector<4x32xf32>
    %18 = arith.mulf %15, %5 : vector<4x32xf32>
    %19 = arith.mulf %14, %16 : vector<4x32xf32>
    %20 = arith.addf %18, %19 : vector<4x32xf32>
    %21 = math.tanh %20 : vector<4x32xf32>
    %22 = arith.mulf %17, %21 : vector<4x32xf32>
    %c0_8 = arith.constant 0 : index
    %c0_9 = arith.constant 0 : index
    %23 = vector.load %arg7[%c0_8, %c0_9] : memref<32x32xf32, #tpu.memory_space<vmem>>, vector<4x32xf32>
    tpu.vector_store %arg7[%c0_8, %c0_9], %22 {strides = array<i32>} : memref<32x32xf32, #tpu.memory_space<vmem>>, vector<4x32xf32>,
    %cst_10 = arith.constant dense<0.000000e+00> : vector<4x128xf32>
    %24 = tpu.matmul %22, %0, %cst_10 {dimension_numbers = #tpu.dot_dimension_numbers<[1], [0], [0], [1], [0, 0, 1, 1], [], []>} : vector<4x32xf32>, vector<32x128xf32>, vector<4x128xf32> -> vector<4x128xf32>
    %25 = arith.addf %24, %3 : vector<4x128xf32>
    %26 = arith.negf %25 : vector<4x128xf32>
    %27 = math.exp %26 : vector<4x128xf32>
    %cst_11 = arith.constant 1.000000e+00 : f32
    %28 = vector.broadcast %cst_11 : f32 to vector<4x128xf32>
    %29 = arith.addf %28, %27 : vector<4x128xf32>
    %30 = arith.divf %28, %29 : vector<4x128xf32>
    %31 = math.tanh %25 : vector<4x128xf32>
    %32 = vector.extract_strided_slice %30 {offsets = [0, 0], sizes = [4, 32], strides = [1, 1]} : vector<4x128xf32> to vector<4x32xf32>
    %33 = vector.extract_strided_slice %30 {offsets = [0, 32], sizes = [4, 32], strides = [1, 1]} : vector<4x128xf32> to vector<4x32xf32>
    %34 = vector.extract_strided_slice %31 {offsets = [0, 64], sizes = [4, 32], strides = [1, 1]} : vector<4x128xf32> to vector<4x32xf32>
    %35 = vector.extract_strided_slice %30 {offsets = [0, 96], sizes = [4, 32], strides = [1, 1]} : vector<4x128xf32> to vector<4x32xf32>
    %36 = arith.mulf %33, %20 : vector<4x32xf32>
    %37 = arith.mulf %32, %34 : vector<4x32xf32>
    %38 = arith.addf %36, %37 : vector<4x32xf32>
    %39 = math.tanh %38 : vector<4x32xf32>
    %40 = arith.mulf %35, %39 : vector<4x32xf32>
    %c4 = arith.constant 4 : index
    %c0_12 = arith.constant 0 : index
    %41 = vector.load %arg7[%c4, %c0_12] : memref<32x32xf32, #tpu.memory_space<vmem>>, vector<4x32xf32>
    tpu.vector_store %arg7[%c4, %c0_12], %40 {strides = array<i32>} : memref<32x32xf32, #tpu.memory_space<vmem>>, vector<4x32xf32>,
    %cst_13 = arith.constant dense<0.000000e+00> : vector<4x128xf32>
    %42 = tpu.matmul %40, %0, %cst_13 {dimension_numbers = #tpu.dot_dimension_numbers<[1], [0], [0], [1], [0, 0, 1, 1], [], []>} : vector<4x32xf32>, vector<32x128xf32>, vector<4x128xf32> -> vector<4x128xf32>
    %43 = arith.addf %42, %3 : vector<4x128xf32>
    %44 = arith.negf %43 : vector<4x128xf32>
    %45 = math.exp %44 : vector<4x128xf32>
    %cst_14 = arith.constant 1.000000e+00 : f32
    %46 = vector.broadcast %cst_14 : f32 to vector<4x128xf32>
    %47 = arith.addf %46, %45 : vector<4x128xf32>
    %48 = arith.divf %46, %47 : vector<4x128xf32>
    %49 = math.tanh %43 : vector<4x128xf32>
    %50 = vector.extract_strided_slice %48 {offsets = [0, 0], sizes = [4, 32], strides = [1, 1]} : vector<4x128xf32> to vector<4x32xf32>
    %51 = vector.extract_strided_slice %48 {offsets = [0, 32], sizes = [4, 32], strides = [1, 1]} : vector<4x128xf32> to vector<4x32xf32>
    %52 = vector.extract_strided_slice %49 {offsets = [0, 64], sizes = [4, 32], strides = [1, 1]} : vector<4x128xf32> to vector<4x32xf32>
    %53 = vector.extract_strided_slice %48 {offsets = [0, 96], sizes = [4, 32], strides = [1, 1]} : vector<4x128xf32> to vector<4x32xf32>
    %54 = arith.mulf %51, %38 : vector<4x32xf32>
    %55 = arith.mulf %50, %52 : vector<4x32xf32>
    %56 = arith.addf %54, %55 : vector<4x32xf32>
    %57 = math.tanh %56 : vector<4x32xf32>
    %58 = arith.mulf %53, %57 : vector<4x32xf32>
    %c8 = arith.constant 8 : index
    %c0_15 = arith.constant 0 : index
    %59 = vector.load %arg7[%c8, %c0_15] : memref<32x32xf32, #tpu.memory_space<vmem>>, vector<4x32xf32>
    tpu.vector_store %arg7[%c8, %c0_15], %58 {strides = array<i32>} : memref<32x32xf32, #tpu.memory_space<vmem>>, vector<4x32xf32>,
    %cst_16 = arith.constant dense<0.000000e+00> : vector<4x128xf32>
    %60 = tpu.matmul %58, %0, %cst_16 {dimension_numbers = #tpu.dot_dimension_numbers<[1], [0], [0], [1], [0, 0, 1, 1], [], []>} : vector<4x32xf32>, vector<32x128xf32>, vector<4x128xf32> -> vector<4x128xf32>
    %61 = arith.addf %60, %3 : vector<4x128xf32>
    %62 = arith.negf %61 : vector<4x128xf32>
    %63 = math.exp %62 : vector<4x128xf32>
    %cst_17 = arith.constant 1.000000e+00 : f32
    %64 = vector.broadcast %cst_17 : f32 to vector<4x128xf32>
    %65 = arith.addf %64, %63 : vector<4x128xf32>
    %66 = arith.divf %64, %65 : vector<4x128xf32>
    %67 = math.tanh %61 : vector<4x128xf32>
    %68 = vector.extract_strided_slice %66 {offsets = [0, 0], sizes = [4, 32], strides = [1, 1]} : vector<4x128xf32> to vector<4x32xf32>
    %69 = vector.extract_strided_slice %66 {offsets = [0, 32], sizes = [4, 32], strides = [1, 1]} : vector<4x128xf32> to vector<4x32xf32>
    %70 = vector.extract_strided_slice %67 {offsets = [0, 64], sizes = [4, 32], strides = [1, 1]} : vector<4x128xf32> to vector<4x32xf32>
    %71 = vector.extract_strided_slice %66 {offsets = [0, 96], sizes = [4, 32], strides = [1, 1]} : vector<4x128xf32> to vector<4x32xf32>
    %72 = arith.mulf %69, %56 : vector<4x32xf32>
    %73 = arith.mulf %68, %70 : vector<4x32xf32>
    %74 = arith.addf %72, %73 : vector<4x32xf32>
    %75 = math.tanh %74 : vector<4x32xf32>
    %76 = arith.mulf %71, %75 : vector<4x32xf32>
    %c12 = arith.constant 12 : index
    %c0_18 = arith.constant 0 : index
    %77 = vector.load %arg7[%c12, %c0_18] : memref<32x32xf32, #tpu.memory_space<vmem>>, vector<4x32xf32>
    tpu.vector_store %arg7[%c12, %c0_18], %76 {strides = array<i32>} : memref<32x32xf32, #tpu.memory_space<vmem>>, vector<4x32xf32>,
    %cst_19 = arith.constant dense<0.000000e+00> : vector<4x128xf32>
    %78 = tpu.matmul %76, %0, %cst_19 {dimension_numbers = #tpu.dot_dimension_numbers<[1], [0], [0], [1], [0, 0, 1, 1], [], []>} : vector<4x32xf32>, vector<32x128xf32>, vector<4x128xf32> -> vector<4x128xf32>
    %79 = arith.addf %78, %3 : vector<4x128xf32>
    %80 = arith.negf %79 : vector<4x128xf32>
    %81 = math.exp %80 : vector<4x128xf32>
    %cst_20 = arith.constant 1.000000e+00 : f32
    %82 = vector.broadcast %cst_20 : f32 to vector<4x128xf32>
    %83 = arith.addf %82, %81 : vector<4x128xf32>
    %84 = arith.divf %82, %83 : vector<4x128xf32>
    %85 = math.tanh %79 : vector<4x128xf32>
    %86 = vector.extract_strided_slice %84 {offsets = [0, 0], sizes = [4, 32], strides = [1, 1]} : vector<4x128xf32> to vector<4x32xf32>
    %87 = vector.extract_strided_slice %84 {offsets = [0, 32], sizes = [4, 32], strides = [1, 1]} : vector<4x128xf32> to vector<4x32xf32>
    %88 = vector.extract_strided_slice %85 {offsets = [0, 64], sizes = [4, 32], strides = [1, 1]} : vector<4x128xf32> to vector<4x32xf32>
    %89 = vector.extract_strided_slice %84 {offsets = [0, 96], sizes = [4, 32], strides = [1, 1]} : vector<4x128xf32> to vector<4x32xf32>
    %90 = arith.mulf %87, %74 : vector<4x32xf32>
    %91 = arith.mulf %86, %88 : vector<4x32xf32>
    %92 = arith.addf %90, %91 : vector<4x32xf32>
    %93 = math.tanh %92 : vector<4x32xf32>
    %94 = arith.mulf %89, %93 : vector<4x32xf32>
    %c16 = arith.constant 16 : index
    %c0_21 = arith.constant 0 : index
    %95 = vector.load %arg7[%c16, %c0_21] : memref<32x32xf32, #tpu.memory_space<vmem>>, vector<4x32xf32>
    tpu.vector_store %arg7[%c16, %c0_21], %94 {strides = array<i32>} : memref<32x32xf32, #tpu.memory_space<vmem>>, vector<4x32xf32>,
    %cst_22 = arith.constant dense<0.000000e+00> : vector<4x128xf32>
    %96 = tpu.matmul %94, %0, %cst_22 {dimension_numbers = #tpu.dot_dimension_numbers<[1], [0], [0], [1], [0, 0, 1, 1], [], []>} : vector<4x32xf32>, vector<32x128xf32>, vector<4x128xf32> -> vector<4x128xf32>
    %97 = arith.addf %96, %3 : vector<4x128xf32>
    %98 = arith.negf %97 : vector<4x128xf32>
    %99 = math.exp %98 : vector<4x128xf32>
    %cst_23 = arith.constant 1.000000e+00 : f32
    %100 = vector.broadcast %cst_23 : f32 to vector<4x128xf32>
    %101 = arith.addf %100, %99 : vector<4x128xf32>
    %102 = arith.divf %100, %101 : vector<4x128xf32>
    %103 = math.tanh %97 : vector<4x128xf32>
    %104 = vector.extract_strided_slice %102 {offsets = [0, 0], sizes = [4, 32], strides = [1, 1]} : vector<4x128xf32> to vector<4x32xf32>
    %105 = vector.extract_strided_slice %102 {offsets = [0, 32], sizes = [4, 32], strides = [1, 1]} : vector<4x128xf32> to vector<4x32xf32>
    %106 = vector.extract_strided_slice %103 {offsets = [0, 64], sizes = [4, 32], strides = [1, 1]} : vector<4x128xf32> to vector<4x32xf32>
    %107 = vector.extract_strided_slice %102 {offsets = [0, 96], sizes = [4, 32], strides = [1, 1]} : vector<4x128xf32> to vector<4x32xf32>
    %108 = arith.mulf %105, %92 : vector<4x32xf32>
    %109 = arith.mulf %104, %106 : vector<4x32xf32>
    %110 = arith.addf %108, %109 : vector<4x32xf32>
    %111 = math.tanh %110 : vector<4x32xf32>
    %112 = arith.mulf %107, %111 : vector<4x32xf32>
    %c20 = arith.constant 20 : index
    %c0_24 = arith.constant 0 : index
    %113 = vector.load %arg7[%c20, %c0_24] : memref<32x32xf32, #tpu.memory_space<vmem>>, vector<4x32xf32>
    tpu.vector_store %arg7[%c20, %c0_24], %112 {strides = array<i32>} : memref<32x32xf32, #tpu.memory_space<vmem>>, vector<4x32xf32>,
    %cst_25 = arith.constant dense<0.000000e+00> : vector<4x128xf32>
    %114 = tpu.matmul %112, %0, %cst_25 {dimension_numbers = #tpu.dot_dimension_numbers<[1], [0], [0], [1], [0, 0, 1, 1], [], []>} : vector<4x32xf32>, vector<32x128xf32>, vector<4x128xf32> -> vector<4x128xf32>
    %115 = arith.addf %114, %3 : vector<4x128xf32>
    %116 = arith.negf %115 : vector<4x128xf32>
    %117 = math.exp %116 : vector<4x128xf32>
    %cst_26 = arith.constant 1.000000e+00 : f32
    %118 = vector.broadcast %cst_26 : f32 to vector<4x128xf32>
    %119 = arith.addf %118, %117 : vector<4x128xf32>
    %120 = arith.divf %118, %119 : vector<4x128xf32>
    %121 = math.tanh %115 : vector<4x128xf32>
    %122 = vector.extract_strided_slice %120 {offsets = [0, 0], sizes = [4, 32], strides = [1, 1]} : vector<4x128xf32> to vector<4x32xf32>
    %123 = vector.extract_strided_slice %120 {offsets = [0, 32], sizes = [4, 32], strides = [1, 1]} : vector<4x128xf32> to vector<4x32xf32>
    %124 = vector.extract_strided_slice %121 {offsets = [0, 64], sizes = [4, 32], strides = [1, 1]} : vector<4x128xf32> to vector<4x32xf32>
    %125 = vector.extract_strided_slice %120 {offsets = [0, 96], sizes = [4, 32], strides = [1, 1]} : vector<4x128xf32> to vector<4x32xf32>
    %126 = arith.mulf %123, %110 : vector<4x32xf32>
    %127 = arith.mulf %122, %124 : vector<4x32xf32>
    %128 = arith.addf %126, %127 : vector<4x32xf32>
    %129 = math.tanh %128 : vector<4x32xf32>
    %130 = arith.mulf %125, %129 : vector<4x32xf32>
    %c24 = arith.constant 24 : index
    %c0_27 = arith.constant 0 : index
    %131 = vector.load %arg7[%c24, %c0_27] : memref<32x32xf32, #tpu.memory_space<vmem>>, vector<4x32xf32>
    tpu.vector_store %arg7[%c24, %c0_27], %130 {strides = array<i32>} : memref<32x32xf32, #tpu.memory_space<vmem>>, vector<4x32xf32>,
    %cst_28 = arith.constant dense<0.000000e+00> : vector<4x128xf32>
    %132 = tpu.matmul %130, %0, %cst_28 {dimension_numbers = #tpu.dot_dimension_numbers<[1], [0], [0], [1], [0, 0, 1, 1], [], []>} : vector<4x32xf32>, vector<32x128xf32>, vector<4x128xf32> -> vector<4x128xf32>
    %133 = arith.addf %132, %3 : vector<4x128xf32>
    %134 = arith.negf %133 : vector<4x128xf32>
    %135 = math.exp %134 : vector<4x128xf32>
    %cst_29 = arith.constant 1.000000e+00 : f32
    %136 = vector.broadcast %cst_29 : f32 to vector<4x128xf32>
    %137 = arith.addf %136, %135 : vector<4x128xf32>
    %138 = arith.divf %136, %137 : vector<4x128xf32>
    %139 = math.tanh %133 : vector<4x128xf32>
    %140 = vector.extract_strided_slice %138 {offsets = [0, 0], sizes = [4, 32], strides = [1, 1]} : vector<4x128xf32> to vector<4x32xf32>
    %141 = vector.extract_strided_slice %138 {offsets = [0, 32], sizes = [4, 32], strides = [1, 1]} : vector<4x128xf32> to vector<4x32xf32>
    %142 = vector.extract_strided_slice %139 {offsets = [0, 64], sizes = [4, 32], strides = [1, 1]} : vector<4x128xf32> to vector<4x32xf32>
    %143 = vector.extract_strided_slice %138 {offsets = [0, 96], sizes = [4, 32], strides = [1, 1]} : vector<4x128xf32> to vector<4x32xf32>
    %144 = arith.mulf %141, %128 : vector<4x32xf32>
    %145 = arith.mulf %140, %142 : vector<4x32xf32>
    %146 = arith.addf %144, %145 : vector<4x32xf32>
    %147 = math.tanh %146 : vector<4x32xf32>
    %148 = arith.mulf %143, %147 : vector<4x32xf32>
    %c28 = arith.constant 28 : index
    %c0_30 = arith.constant 0 : index
    %149 = vector.load %arg7[%c28, %c0_30] : memref<32x32xf32, #tpu.memory_space<vmem>>, vector<4x32xf32>
    tpu.vector_store %arg7[%c28, %c0_30], %148 {strides = array<i32>} : memref<32x32xf32, #tpu.memory_space<vmem>>, vector<4x32xf32>,
    %c0_31 = arith.constant 0 : index
    %c0_32 = arith.constant 0 : index
    %150 = vector.load %arg7[%c0_31, %c0_32] : memref<32x32xf32, #tpu.memory_space<vmem>>, vector<32x32xf32>
    %c0_33 = arith.constant 0 : index
    %c0_34 = arith.constant 0 : index
    %151 = vector.load %arg4[%c0_33, %c0_34] : memref<32x2xf32, #tpu.memory_space<vmem>>, vector<32x2xf32>
    %cst_35 = arith.constant dense<0.000000e+00> : vector<32x2xf32>
    %152 = tpu.matmul %150, %151, %cst_35 {dimension_numbers = #tpu.dot_dimension_numbers<[1], [0], [0], [1], [0, 0, 1, 1], [], []>} : vector<32x32xf32>, vector<32x2xf32>, vector<32x2xf32> -> vector<32x2xf32>
    %c0_36 = arith.constant 0 : index
    %c0_37 = arith.constant 0 : index
    %153 = vector.load %arg5[%c0_36, %c0_37] : memref<1x2xf32, #tpu.memory_space<vmem>>, vector<1x2xf32>
    %154 = vector.broadcast %153 : vector<1x2xf32> to vector<32x2xf32>
    %155 = arith.addf %152, %154 : vector<32x2xf32>
    %c0_38 = arith.constant 0 : index
    %c0_39 = arith.constant 0 : index
    %156 = vector.load %arg6[%c0_38, %c0_39] : memref<32x2xf32, #tpu.memory_space<vmem>>, vector<32x2xf32>
    tpu.vector_store %arg6[%c0_38, %c0_39], %155 {strides = array<i32>} : memref<32x2xf32, #tpu.memory_space<vmem>>, vector<32x2xf32>,
    return
  }
}

</mosaic_0001>

<bundles_post_ra>
// kernel: tpu_custom_call.1
= control target key start
LH: loop header
LB: loop body
LE: loop exit
PB: predicated region body
PF: predicated region fallthrough
CT: control target
= control target key end

     0   :  { %v1269_v0 = vmov 0.0|0.0   ;;  %vm1270_vm0 = vmmov 0   ;;  %v1271_v4 = vmov 0.0   ;;  %vm36_vm1 = vcmask 261120   ;;  %s1272_s7 = smov 64   ;;  %s1273_s10 = smov 32   ;;  %s1482_s2 = inlined_call_operand.vmem [shape: f32[32,128], index: 2, kind: input, shape index: {}]   ;;  %s1483_s0 = inlined_call_operand.vmem [shape: f32[4,32], index: 0, kind: input, shape index: {}]   ;;  %s1484_s3 = inlined_call_operand.vmem [shape: f32[1,128], index: 3, kind: input, shape index: {}]   ;;  %s1485_s1 = inlined_call_operand.vmem [shape: f32[4,32], index: 1, kind: input, shape index: {}]   ;;  %s1486_s4 = inlined_call_operand.vmem [shape: f32[32,2], index: 4, kind: input, shape index: {}]   ;;  %s1487_s5 = inlined_call_operand.vmem [shape: f32[1,2], index: 5, kind: input, shape index: {}]   ;;  %s1488_s6 = inlined_call_operand.vmem [shape: f32[32,2], index: 6, kind: output, shape index: {}]  }
   0x1   :  { %1144 = vmatprep.subr.bf16.mxu1 %v1269_v0  ;;  %v23_v1 = vld [vmem:[%s1482_s2] sm:$0xff]  ;;  %v24_v2 = vld [vmem:[%s1482_s2 + $0x8] sm:$0xff]  ;;  %v25_v3 = vld [vmem:[%s1482_s2 + $0x10] sm:$0xff]  ;;  %1050 = vmatprep.mubr.msk.f32.mxu1 %vm1270_vm0, %v1271_v4  ;;  %vm142_vm2 = vcmask 257024   ;;  %vm963_vm3 = vcmask 15360  }
   0x2   :  { %v1321_v5 = vpack.c.bf16 %v24_v2, %v23_v1  ;;  %v26_v6 = vld [vmem:[%s1482_s2 + $0x18] sm:$0xff]  ;;  %1156 = vmatprep.subr.bf16.mxu0 %v1269_v0  ;;  %1072 = vmatprep.mubr.msk.f32.mxu0 %vm1270_vm0, %v1271_v4  ;;  %v34_v8 = vld [vmem:[%s1483_s0] sm:$0xf] }
   0x3   :  { %v1330_v7 = vpack.c.bf16 %v26_v6, %v25_v3  ;;  %v1352_v9 = vld [vmem:[%s1484_s3] ss:$0 sm:$0xff] }
   0x4   :  { %1146 = vmatpush3.bf16.msra.mxu1 %v1321_v5  ;;  %1158 = vmatpush3.bf16.msra.mxu0 %v1321_v5  ;;  %v35_v14 = vld [vmem:[%s1485_s1] sm:$0xf] }
   0x5   :  { %1147 = vmatprep.subr.bf16.mxu1 %v1269_v0  ;;  %1159 = vmatprep.subr.bf16.mxu0 %v1269_v0 }
   0x8   :  { %1149 = vmatpush3.bf16.msra.mxu1 %v1330_v7  ;;  %1161 = vmatpush3.bf16.msra.mxu0 %v1330_v7 }
   0x9   :  { %1150 = vmatprep.subr.bf16.mxu1 %v1269_v0  ;;  %1168 = vmatprep.subr.bf16.mxu0 %v1269_v0 }
   0xb   :  { %1051 = vmatmul.mubr.msk.f32.vlgmr.msra.gmra.mrb[0].mxu1 %vm36_vm1, %v34_v8 }
   0xc   :  { %1152 = vmatpush3.bf16.msra.mxu1 %v1321_v5  ;;  %1061 = vmatprep.mubr.msk.f32.mxu1 %vm1270_vm0, %v1271_v4 }
   0xd   :  { %1153 = vmatprep.subr.bf16.mxu1 %v1269_v0 }
  0x10   :  { %1155 = vmatpush3.bf16.msra.mxu1 %v1330_v7 }
  0x11   :  { %1162 = vmatprep.subr.bf16.mxu1 %v1269_v0 }
  0xde   :  { %v106_v10 = vpop.f32.mrb[0].mxu1 }
  0xdf   :  { %v107_v11 = vadd.f32 %v1352_v9, %v106_v10  ;;  %v1052_v12 = vpop.f32.mrb[1].mxu1 }
  0xe1   :  { %1205 = vtanh.f32 %v107_v11  ;;  %v974_v15 = vmul.f32 -1.442695, %v107_v11 }
  0xe3   :  { %1207 = vpow2.f32 %v974_v15 }
  0xeb   :  { %v1206_v13 = vpop.eup %1205 }
  0xec   :  { %123 = vrot.lane.b32.xlu0 %v1206_v13, %s1272_s7 }
  0xed   :  { %v1208_v16 = vpop.eup %1207 }
  0xee   :  { %v113_v17 = vadd.f32 1.0, %v1208_v16 }
  0xf0   :  { %118 = vrot.lane.b32.xlu0 %v35_v14, %s1273_s10  ;;  %1209 = vrcp.f32 %v113_v17 }
  0xfa   :  { %v1210_v18 = vpop.eup %1209 }
 0x15e   :  { %v124_v19 = vpop.permute.xlu0 %123 }
 0x15f   :  { %v126_v20 = vmul.f32 %v1210_v18, %v124_v19 }
 0x161   :  { %128 = vrot.lane.b32.xlu1 %v126_v20, %s1273_s10 }
 0x162   :  { %v119_v21 = vpop.permute.xlu0 %118 }
 0x163   :  { %v121_v22 = vmul.f32 %v1210_v18, %v119_v21 }
 0x1d3   :  { %v129_v23 = vpop.permute.xlu1 %128 }
 0x1d4   :  { %v131_v24 = vadd.f32 %v129_v23, %v121_v22 }
 0x1d6   :  { %1211 = vtanh.f32 %v131_v24 }
 0x1e0   :  { %v1212_v25 = vpop.eup %1211 }
 0x1e1   :  { %134 = vrot.lane.b32.xlu1 %v1212_v25, %s1272_s7 }
 0x253   :  { %v135_v26 = vpop.permute.xlu1 %134 }
 0x254   :  { %v137_v27 = vmul.f32 %v1210_v18, %v135_v26 }
 0x256   :  { %139 = vrot.lane.b32.xlu0 %v137_v27, %s1273_s10 }
 0x2c8   :  { %v140_v28 = vpop.permute.xlu0 %139 }
 0x2c9   :  { %143 = vst.msk [vmem:[#allocation2] sm:$0xf] %vm142_vm2, %v140_v28  ;;  %1062 = vmatmul.mubr.msk.f32.vlgmr.msra.gmra.mrb[2].mxu1 %vm36_vm1, %v140_v28 }
 0x2ca   :  { %1164 = vmatpush3.bf16.msra.mxu1 %v1321_v5  ;;  %1083 = vmatprep.mubr.msk.f32.mxu1 %vm1270_vm0, %v1271_v4 }
 0x2cb   :  { %1165 = vmatprep.subr.bf16.mxu1 %v1269_v0 }
 0x2ce   :  { %1167 = vmatpush3.bf16.msra.mxu1 %v1330_v7 }
 0x2cf   :  { %1174 = vmatprep.subr.bf16.mxu1 %v1269_v0 }
 0x39c   :  { %v212_v29 = vpop.f32.mrb[2].mxu1 }
 0x39d   :  { %v213_v30 = vadd.f32 %v1352_v9, %v212_v29  ;;  %v1063_v31 = vpop.f32.mrb[3].mxu1 }
 0x39f   :  { %1213 = vtanh.f32 %v213_v30  ;;  %v976_v33 = vmul.f32 -1.442695, %v213_v30 }
 0x3a1   :  { %1215 = vpow2.f32 %v976_v33 }
 0x3a9   :  { %v1214_v32 = vpop.eup %1213 }
 0x3aa   :  { %225 = vrot.lane.b32.xlu1 %v1214_v32, %s1272_s7 }
 0x3ab   :  { %v1216_v34 = vpop.eup %1215 }
 0x3ac   :  { %v219_v35 = vadd.f32 1.0, %v1216_v34 }
 0x3ae   :  { %1217 = vrcp.f32 %v219_v35 }
 0x3b8   :  { %v1218_v36 = vpop.eup %1217 }
 0x3b9   :  { %v223_v39 = vmul.f32 %v1218_v36, %v131_v24 }
 0x41c   :  { %v226_v37 = vpop.permute.xlu1 %225 }
 0x41d   :  { %v228_v38 = vmul.f32 %v1218_v36, %v226_v37 }
 0x41f   :  { %230 = vrot.lane.b32.xlu0 %v228_v38, %s1273_s10 }
 0x491   :  { %v231_v40 = vpop.permute.xlu0 %230 }
 0x492   :  { %v233_v41 = vadd.f32 %v231_v40, %v223_v39 }
 0x494   :  { %1219 = vtanh.f32 %v233_v41 }
 0x49e   :  { %v1220_v42 = vpop.eup %1219 }
 0x49f   :  { %236 = vrot.lane.b32.xlu1 %v1220_v42, %s1272_s7 }
 0x511   :  { %v237_v43 = vpop.permute.xlu1 %236 }
 0x512   :  { %v239_v44 = vmul.f32 %v1218_v36, %v237_v43 }
 0x514   :  { %241 = vrot.lane.b32.xlu0 %v239_v44, %s1273_s10 }
 0x586   :  { %v242_v45 = vpop.permute.xlu0 %241 }
 0x587   :  { %244 = vst.msk [vmem:[#allocation2 + $0x4] sm:$0xf] %vm142_vm2, %v242_v45  ;;  %1073 = vmatmul.mubr.msk.f32.vlgmr.msra.gmra.mrb[0].mxu0 %vm36_vm1, %v242_v45 }
 0x588   :  { %1170 = vmatpush3.bf16.msra.mxu0 %v1321_v5  ;;  %1094 = vmatprep.mubr.msk.f32.mxu0 %vm1270_vm0, %v1271_v4 }
 0x589   :  { %1171 = vmatprep.subr.bf16.mxu0 %v1269_v0 }
 0x58c   :  { %1173 = vmatpush3.bf16.msra.mxu0 %v1330_v7 }
 0x58d   :  { %1180 = vmatprep.subr.bf16.mxu0 %v1269_v0 }
 0x65a   :  { %v313_v46 = vpop.f32.mrb[0].mxu0 }
 0x65b   :  { %v314_v47 = vadd.f32 %v1352_v9, %v313_v46  ;;  %v1074_v48 = vpop.f32.mrb[1].mxu0 }
 0x65c   :  { %v856_v48 = vld [vmem:[%s1486_s4 + $0x8] sm:$0xff] }
 0x65d   :  { %1221 = vtanh.f32 %v314_v47  ;;  %v978_v50 = vmul.f32 -1.442695, %v314_v47  ;;  %v855_v47 = vld [vmem:[%s1486_s4] sm:$0xff] }
 0x65f   :  { %1223 = vpow2.f32 %v978_v50 }
 0x667   :  { %v1222_v49 = vpop.eup %1221 }
 0x668   :  { %326 = vrot.lane.b32.xlu1 %v1222_v49, %s1272_s7  ;;  %v1192_v49 = vpack.c.bf16 %v856_v48, %v855_v47 }
 0x669   :  { %v1224_v51 = vpop.eup %1223 }
 0x66a   :  { %v320_v52 = vadd.f32 1.0, %v1224_v51 }
 0x66c   :  { %1225 = vrcp.f32 %v320_v52 }
 0x676   :  { %v1226_v53 = vpop.eup %1225 }
 0x677   :  { %v324_v56 = vmul.f32 %v1226_v53, %v233_v41 }
 0x6da   :  { %v327_v54 = vpop.permute.xlu1 %326 }
 0x6db   :  { %v329_v55 = vmul.f32 %v1226_v53, %v327_v54  ;;  %v858_v54 = vld [vmem:[%s1486_s4 + $0x18] sm:$0xff] }
 0x6dd   :  { %331 = vrot.lane.b32.xlu0 %v329_v55, %s1273_s10 }
 0x74f   :  { %v332_v57 = vpop.permute.xlu0 %331 }
 0x750   :  { %v334_v58 = vadd.f32 %v332_v57, %v324_v56  ;;  %v851_v57 = vld [vmem:[#allocation2] sm:$0xff] }
 0x752   :  { %1227 = vtanh.f32 %v334_v58 }
 0x75c   :  { %v1228_v59 = vpop.eup %1227 }
 0x75d   :  { %337 = vrot.lane.b32.xlu1 %v1228_v59, %s1272_s7 }
 0x7cf   :  { %v338_v60 = vpop.permute.xlu1 %337 }
 0x7d0   :  { %v340_v61 = vmul.f32 %v1226_v53, %v338_v60  ;;  %v857_v53 = vld [vmem:[%s1486_s4 + $0x10] sm:$0xff] }
 0x7d1   :  { %v1196_v55 = vpack.c.bf16 %v858_v54, %v857_v53 }
 0x7d2   :  { %342 = vrot.lane.b32.xlu0 %v340_v61, %s1273_s10 }
 0x844   :  { %v343_v62 = vpop.permute.xlu0 %342 }
 0x845   :  { %345 = vst.msk [vmem:[#allocation2 + $0x8] sm:$0xf] %vm142_vm2, %v343_v62  ;;  %1084 = vmatmul.mubr.msk.f32.vlgmr.msra.gmra.mrb[4].mxu1 %vm36_vm1, %v343_v62 }
 0x846   :  { %1176 = vmatpush3.bf16.msra.mxu1 %v1321_v5  ;;  %1105 = vmatprep.mubr.msk.f32.mxu1 %vm1270_vm0, %v1271_v4 }
 0x847   :  { %1177 = vmatprep.subr.bf16.mxu1 %v1269_v0 }
 0x84a   :  { %1179 = vmatpush3.bf16.msra.mxu1 %v1330_v7 }
 0x84b   :  { %1186 = vmatprep.subr.bf16.mxu1 %v1269_v0 }
 0x918   :  { %v414_v63 = vpop.f32.mrb[4].mxu1 }
 0x919   :  { %v415_v1 = vadd.f32 %v1352_v9, %v414_v63  ;;  %v1085_v2 = vpop.f32.mrb[5].mxu1  ;;  %v1447_v63 = vld [vmem:[%s1487_s5] ss:$0 sm:$0xff] }
 0x91b   :  { %1229 = vtanh.f32 %v415_v1  ;;  %v980_v6 = vmul.f32 -1.442695, %v415_v1 }
 0x91d   :  { %1231 = vpow2.f32 %v980_v6 }
 0x925   :  { %v1230_v3 = vpop.eup %1229 }
 0x926   :  { %427 = vrot.lane.b32.xlu1 %v1230_v3, %s1272_s7 }
 0x927   :  { %v1232_v8 = vpop.eup %1231 }
 0x928   :  { %v421_v10 = vadd.f32 1.0, %v1232_v8 }
 0x92a   :  { %1233 = vrcp.f32 %v421_v10 }
 0x934   :  { %v1234_v11 = vpop.eup %1233 }
 0x935   :  { %v425_v14 = vmul.f32 %v1234_v11, %v334_v58 }
 0x998   :  { %v428_v12 = vpop.permute.xlu1 %427 }
 0x999   :  { %v430_v13 = vmul.f32 %v1234_v11, %v428_v12 }
 0x99b   :  { %432 = vrot.lane.b32.xlu0 %v430_v13, %s1273_s10 }
 0xa0d   :  { %v433_v15 = vpop.permute.xlu0 %432 }
 0xa0e   :  { %v435_v16 = vadd.f32 %v433_v15, %v425_v14 }
 0xa10   :  { %1235 = vtanh.f32 %v435_v16 }
 0xa1a   :  { %v1236_v17 = vpop.eup %1235 }
 0xa1b   :  { %438 = vrot.lane.b32.xlu1 %v1236_v17, %s1272_s7 }
 0xa8d   :  { %v439_v18 = vpop.permute.xlu1 %438 }
 0xa8e   :  { %v441_v19 = vmul.f32 %v1234_v11, %v439_v18 }
 0xa90   :  { %443 = vrot.lane.b32.xlu0 %v441_v19, %s1273_s10 }
 0xb02   :  { %v444_v20 = vpop.permute.xlu0 %443 }
 0xb03   :  { %446 = vst.msk [vmem:[#allocation2 + $0xc] sm:$0xf] %vm142_vm2, %v444_v20  ;;  %1095 = vmatmul.mubr.msk.f32.vlgmr.msra.gmra.mrb[2].mxu0 %vm36_vm1, %v444_v20 }
 0xb04   :  { %1182 = vmatpush3.bf16.msra.mxu0 %v1321_v5  ;;  %1116 = vmatprep.mubr.msk.f32.mxu0 %vm1270_vm0, %v1271_v4 }
 0xb05   :  { %1183 = vmatprep.subr.bf16.mxu0 %v1269_v0 }
 0xb08   :  { %1185 = vmatpush3.bf16.msra.mxu0 %v1330_v7 }
 0xb09   :  { %1193 = vmatprep.subr.bf16.mxu0 %v1192_v49 }
 0xb0a   :  { %v852_v58 = vld [vmem:[#allocation2 + $0x8] sm:$0xff] }
 0xbd6   :  { %v515_v21 = vpop.f32.mrb[2].mxu0 }
 0xbd7   :  { %v516_v22 = vadd.f32 %v1352_v9, %v515_v21  ;;  %v1096_v23 = vpop.f32.mrb[3].mxu0 }
 0xbd9   :  { %1237 = vtanh.f32 %v516_v22  ;;  %v982_v25 = vmul.f32 -1.442695, %v516_v22 }
 0xbdb   :  { %1239 = vpow2.f32 %v982_v25 }
 0xbe3   :  { %v1238_v24 = vpop.eup %1237 }
 0xbe4   :  { %528 = vrot.lane.b32.xlu1 %v1238_v24, %s1272_s7 }
 0xbe5   :  { %v1240_v26 = vpop.eup %1239 }
 0xbe6   :  { %v522_v27 = vadd.f32 1.0, %v1240_v26 }
 0xbe8   :  { %1241 = vrcp.f32 %v522_v27 }
 0xbf2   :  { %v1242_v28 = vpop.eup %1241 }
 0xbf3   :  { %v526_v31 = vmul.f32 %v1242_v28, %v435_v16 }
 0xc56   :  { %v529_v29 = vpop.permute.xlu1 %528 }
 0xc57   :  { %v531_v30 = vmul.f32 %v1242_v28, %v529_v29 }
 0xc59   :  { %533 = vrot.lane.b32.xlu0 %v531_v30, %s1273_s10 }
 0xccb   :  { %v534_v32 = vpop.permute.xlu0 %533 }
 0xccc   :  { %v536_v33 = vadd.f32 %v534_v32, %v526_v31 }
 0xcce   :  { %1243 = vtanh.f32 %v536_v33 }
 0xcd8   :  { %v1244_v34 = vpop.eup %1243 }
 0xcd9   :  { %539 = vrot.lane.b32.xlu1 %v1244_v34, %s1272_s7 }
 0xd4b   :  { %v540_v35 = vpop.permute.xlu1 %539 }
 0xd4c   :  { %v542_v36 = vmul.f32 %v1242_v28, %v540_v35 }
 0xd4e   :  { %544 = vrot.lane.b32.xlu0 %v542_v36, %s1273_s10 }
 0xdc0   :  { %v545_v37 = vpop.permute.xlu0 %544 }
 0xdc1   :  { %547 = vst.msk [vmem:[#allocation2 + $0x10] sm:$0xf] %vm142_vm2, %v545_v37  ;;  %1106 = vmatmul.mubr.msk.f32.vlgmr.msra.gmra.mrb[6].mxu1 %vm36_vm1, %v545_v37 }
 0xdc2   :  { %1188 = vmatpush3.bf16.msra.mxu1 %v1321_v5  ;;  %1127 = vmatprep.mubr.msk.f32.mxu1 %vm1270_vm0, %v1271_v4 }
 0xdc3   :  { %1189 = vmatprep.subr.bf16.mxu1 %v1269_v0 }
 0xdc6   :  { %1191 = vmatpush3.bf16.msra.mxu1 %v1330_v7 }
 0xe94   :  { %v616_v38 = vpop.f32.mrb[6].mxu1 }
 0xe95   :  { %v617_v39 = vadd.f32 %v1352_v9, %v616_v38  ;;  %v1107_v40 = vpop.f32.mrb[7].mxu1 }
 0xe97   :  { %1245 = vtanh.f32 %v617_v39  ;;  %v984_v42 = vmul.f32 -1.442695, %v617_v39 }
 0xe99   :  { %1247 = vpow2.f32 %v984_v42 }
 0xea1   :  { %v1246_v41 = vpop.eup %1245 }
 0xea2   :  { %629 = vrot.lane.b32.xlu1 %v1246_v41, %s1272_s7 }
 0xea3   :  { %v1248_v43 = vpop.eup %1247 }
 0xea4   :  { %v623_v44 = vadd.f32 1.0, %v1248_v43 }
 0xea6   :  { %1249 = vrcp.f32 %v623_v44 }
 0xeb0   :  { %v1250_v5 = vpop.eup %1249 }
 0xeb1   :  { %v627_v0 = vmul.f32 %v1250_v5, %v536_v33 }
 0xf14   :  { %v630_v45 = vpop.permute.xlu1 %629 }
 0xf15   :  { %v632_v4 = vmul.f32 %v1250_v5, %v630_v45 }
 0xf17   :  { %634 = vrot.lane.b32.xlu0 %v632_v4, %s1273_s10 }
 0xf89   :  { %v635_v7 = vpop.permute.xlu0 %634 }
 0xf8a   :  { %v637_v46 = vadd.f32 %v635_v7, %v627_v0 }
 0xf8c   :  { %1251 = vtanh.f32 %v637_v46 }
 0xf96   :  { %v1252_v50 = vpop.eup %1251 }
 0xf97   :  { %640 = vrot.lane.b32.xlu1 %v1252_v50, %s1272_s7 }
0x1009   :  { %v641_v51 = vpop.permute.xlu1 %640 }
0x100a   :  { %v643_v52 = vmul.f32 %v1250_v5, %v641_v51 }
0x100c   :  { %645 = vrot.lane.b32.xlu0 %v643_v52, %s1273_s10 }
0x107e   :  { %v646_v56 = vpop.permute.xlu0 %645 }
0x107f   :  { %648 = vst.msk [vmem:[#allocation2 + $0x14] sm:$0xf] %vm142_vm2, %v646_v56  ;;  %1117 = vmatmul.mubr.msk.f32.vlgmr.msra.gmra.mrb[4].mxu0 %vm36_vm1, %v646_v56 }
0x1080   :  { %1195 = vmatpush3.bf16.msra.mxu0 %v1192_v49  ;;  %1138 = vmatprep.mubr.msk.f32.mxu0 %vm36_vm1, %v851_v57 }
0x1081   :  { %1197 = vmatprep.subr.bf16.mxu0 %v1196_v55 }
0x1084   :  { %1199 = vmatpush3.bf16.msra.mxu0 %v1196_v55 }
0x1086   :  { %v853_v59 = vld [vmem:[#allocation2 + $0x10] sm:$0xff] }
0x1087   :  { %1139 = vmatmul.mubr.msk.f32.vlgmr.msra.gmra.mrb[6].mxu0 %vm36_vm1, %v852_v58 }
0x1088   :  { %1141 = vmatprep.mubr.msk.f32.mxu0 %vm36_vm1, %v853_v59 }
0x1152   :  { %v717_v60 = vpop.f32.mrb[4].mxu0 }
0x1153   :  { %v718_v61 = vadd.f32 %v1352_v9, %v717_v60  ;;  %v1118_v62 = vpop.f32.mrb[5].mxu0 }
0x1155   :  { %1253 = vtanh.f32 %v718_v61  ;;  %v986_v10 = vmul.f32 -1.442695, %v718_v61 }
0x1157   :  { %1255 = vpow2.f32 %v986_v10 }
0x115a   :  { %v1140_v1 = vpop.f32.mrb[6].mxu0 }
0x115b   :  { %v950_v2 = vadd.f32 %v1140_v1, %v1447_v63  ;;  %v944_v3 = vpop.f32.mrb[7].mxu0 }
0x115c   :  { %v945_v6 = vadd.f32 %v1447_v63, %v944_v3 }
0x115d   :  { %965 = vst.msk [vmem:[%s1488_s6 + $0x8] sm:$0xff] %vm963_vm3, %v950_v2 }
0x115e   :  { %964 = vst.msk [vmem:[%s1488_s6] sm:$0xff] %vm963_vm3, %v945_v6 }
0x115f   :  { %v1254_v8 = vpop.eup %1253 }
0x1160   :  { %730 = vrot.lane.b32.xlu1 %v1254_v8, %s1272_s7 }
0x1161   :  { %v1256_v11 = vpop.eup %1255 }
0x1162   :  { %v724_v12 = vadd.f32 1.0, %v1256_v11 }
0x1164   :  { %1257 = vrcp.f32 %v724_v12 }
0x116e   :  { %v1258_v13 = vpop.eup %1257 }
0x116f   :  { %v728_v16 = vmul.f32 %v1258_v13, %v637_v46 }
0x11d2   :  { %v731_v14 = vpop.permute.xlu1 %730 }
0x11d3   :  { %v733_v15 = vmul.f32 %v1258_v13, %v731_v14 }
0x11d5   :  { %735 = vrot.lane.b32.xlu0 %v733_v15, %s1273_s10 }
0x1247   :  { %v736_v17 = vpop.permute.xlu0 %735 }
0x1248   :  { %v738_v18 = vadd.f32 %v736_v17, %v728_v16 }
0x124a   :  { %1259 = vtanh.f32 %v738_v18 }
0x1254   :  { %v1260_v19 = vpop.eup %1259 }
0x1255   :  { %741 = vrot.lane.b32.xlu1 %v1260_v19, %s1272_s7 }
0x12c7   :  { %v742_v20 = vpop.permute.xlu1 %741 }
0x12c8   :  { %v744_v21 = vmul.f32 %v1258_v13, %v742_v20 }
0x12ca   :  { %746 = vrot.lane.b32.xlu0 %v744_v21, %s1273_s10 }
0x133c   :  { %v747_v22 = vpop.permute.xlu0 %746 }
0x133d   :  { %749 = vst.msk [vmem:[#allocation2 + $0x18] sm:$0xf] %vm142_vm2, %v747_v22  ;;  %1128 = vmatmul.mubr.msk.f32.vlgmr.msra.gmra.mrb[8].mxu1 %vm36_vm1, %v747_v22 }
0x1410   :  { %v818_v23 = vpop.f32.mrb[8].mxu1 }
0x1411   :  { %v819_v24 = vadd.f32 %v1352_v9, %v818_v23  ;;  %v1129_v25 = vpop.f32.mrb[9].mxu1 }
0x1413   :  { %1261 = vtanh.f32 %v819_v24  ;;  %v988_v27 = vmul.f32 -1.442695, %v819_v24 }
0x1415   :  { %1263 = vpow2.f32 %v988_v27 }
0x141d   :  { %v1262_v26 = vpop.eup %1261 }
0x141e   :  { %831 = vrot.lane.b32.xlu1 %v1262_v26, %s1272_s7 }
0x141f   :  { %v1264_v28 = vpop.eup %1263 }
0x1420   :  { %v825_v29 = vadd.f32 1.0, %v1264_v28 }
0x1422   :  { %1265 = vrcp.f32 %v825_v29 }
0x142c   :  { %v1266_v30 = vpop.eup %1265 }
0x142d   :  { %v829_v33 = vmul.f32 %v1266_v30, %v738_v18 }
0x1490   :  { %v832_v31 = vpop.permute.xlu1 %831 }
0x1491   :  { %v834_v32 = vmul.f32 %v1266_v30, %v832_v31 }
0x1493   :  { %836 = vrot.lane.b32.xlu0 %v834_v32, %s1273_s10 }
0x1505   :  { %v837_v34 = vpop.permute.xlu0 %836 }
0x1506   :  { %v839_v35 = vadd.f32 %v837_v34, %v829_v33 }
0x1508   :  { %1267 = vtanh.f32 %v839_v35 }
0x1512   :  { %v1268_v9 = vpop.eup %1267 }
0x1513   :  { %842 = vrot.lane.b32.xlu1 %v1268_v9, %s1272_s7 }
0x1585   :  { %v843_v36 = vpop.permute.xlu1 %842 }
0x1586   :  { %v845_v37 = vmul.f32 %v1266_v30, %v843_v36 }
0x1588   :  { %847 = vrot.lane.b32.xlu0 %v845_v37, %s1273_s10 }
0x15fa   :  { %v848_v38 = vpop.permute.xlu0 %847 }
0x15fb   :  { %850 = vst.msk [vmem:[#allocation2 + $0x1c] sm:$0xf] %vm142_vm2, %v848_v38 }
0x1602   :  { %v854_v39 = vld [vmem:[#allocation2 + $0x18] sm:$0xff] }
0x1603   :  { %1142 = vmatmul.mubr.msk.f32.gmra.mrb[8].mxu0 %vm36_vm1, %v854_v39 }
0x16d6   :  { %v1143_v40 = vpop.f32.mrb[8].mxu0 }
0x16d7   :  { %v960_v41 = vadd.f32 %v1143_v40, %v1447_v63  ;;  %v954_v42 = vpop.f32.mrb[9].mxu0 }
0x16d8   :  { %v955_v43 = vadd.f32 %v1447_v63, %v954_v42 }
0x16d9   :  { %967 = vst.msk [vmem:[%s1488_s6 + $0x18] sm:$0xff] %vm963_vm3, %v960_v41 }
0x16da   :  { %966 = vst.msk [vmem:[%s1488_s6 + $0x10] sm:$0xff] %vm963_vm3, %v955_v43 }

</bundles_post_ra>
